<compile_context>
chip_gen: v5e
topology: v5e:2x2
jax: 0.10.0
libtpu: 0.0.40
codegen_flags: <defaults>
</compile_context>

<pallas_src>
import jax
import jax.numpy as jnp
import numpy as np
from jax.experimental import pallas as pl
from jax.experimental.pallas import tpu as pltpu  # noqa: F401  (TPU backend)

NUM_ANNEAL_STEPS = 10
T_START = 2.0
T_END = 0.1

# Compile-time linear temperature schedule (inverse temps -> multiply, not divide).
_TEMPS = [T_START + (T_END - T_START) * (t / (NUM_ANNEAL_STEPS - 1))
          for t in range(NUM_ANNEAL_STEPS)]
_INV_TEMPS = [np.float32(1.0 / T) for T in _TEMPS]


def _multi_ising_kernel(thetas_ref, coupling_ref, seg_ref, out_ref):
    """Single invocation: all K perceptrons annealed at once on a (B, K*N) slab."""
    thetas = thetas_ref[...]            # (B, K*N) f32, theta tiled K times along lanes
    coupling = coupling_ref[...]        # (K*N, K*N) bf16, block-diag, pre-symmetrized
    seg = seg_ref[...]                  # (K*N, K) f32 segment indicators

    # Mean-field anneal, fully unrolled (short fixed trip count).  bf16 MXU
    # operands with f32 accumulation; elementwise math stays f32 (v5e-safe).
    s = jnp.tanh(thetas)
    for inv_t in _INV_TEMPS:
        field = jnp.dot(s.astype(jnp.bfloat16), coupling,
                        preferred_element_type=jnp.float32) + thetas
        s = jnp.tanh(field * inv_t)

    # Per-lane Ising energy density, then segmented reduce over each
    # perceptron's N-wide slice via a tiny (B,K*N)x(K*N,K) matmul.
    js = jnp.dot(s.astype(jnp.bfloat16), coupling,
                 preferred_element_type=jnp.float32)                   # (B, K*N)
    h = -0.5 * s * js - thetas * s                                     # (B, K*N)
    out_ref[...] = jnp.dot(h, seg, preferred_element_type=jnp.float32)  # (B, K)


def multi_ising_forward(thetas, gammas, lambdas, offsets, comb_w, comb_b):
    """thetas: (B, N), gammas: (K, N, N), lambdas/offsets/comb_w: (K,), comb_b: (1,)."""
    B, N = thetas.shape
    K = gammas.shape[0]
    KN = K * N

    # Hoisted to the wrapper: symmetrize and pack block-diagonally, cast bf16.
    J = gammas + jnp.swapaxes(gammas, -1, -2)                          # (K, N, N) f32
    coupling_bd = (jnp.einsum('kab,kl->kalb', J, jnp.eye(K, dtype=J.dtype))
                   .reshape(KN, KN).astype(jnp.bfloat16))              # (K*N, K*N)

    theta_tiled = jnp.tile(thetas.astype(jnp.float32), (1, K))         # (B, K*N)
    seg_mat = jnp.repeat(jnp.eye(K, dtype=jnp.float32), N, axis=0)     # (K*N, K)

    cost = pl.CostEstimate(
        flops=int((NUM_ANNEAL_STEPS + 1) * 2 * B * KN * KN + 2 * B * KN * K),
        transcendentals=int((NUM_ANNEAL_STEPS + 1) * B * KN),
        bytes_accessed=int(KN * KN * 2 + B * KN * 4 + KN * K * 4 + B * K * 4),
    )

    energies = pl.pallas_call(
        _multi_ising_kernel,
        out_shape=jax.ShapeDtypeStruct((B, K), jnp.float32),
        in_specs=[
            pl.BlockSpec((B, KN), lambda: (0, 0)),      # tiled thetas
            pl.BlockSpec((KN, KN), lambda: (0, 0)),     # block-diag coupling (bf16)
            pl.BlockSpec((KN, K), lambda: (0, 0)),      # segment indicators
        ],
        out_specs=pl.BlockSpec((B, K), lambda: (0, 0)),  # single energy slab
        cost_estimate=cost,
    )(theta_tiled, coupling_bd, seg_mat)

    # Folded affine: combiner(lambda_k * E_k + offset_k) == E @ w' + b'.
    w_eff = comb_w * lambdas                                           # (K,)
    b_eff = jnp.sum(comb_w * offsets) + comb_b[0]                      # scalar
    return energies @ w_eff + b_eff                                    # (B,)


def multi_ising_reference(thetas, gammas, lambdas, offsets, comb_w, comb_b):
    """Pure-JAX per-perceptron reference with the same precision policy
    (bf16 coupling / MXU operands, f32 accumulation and elementwise math)."""
    K = gammas.shape[0]
    J = (gammas + jnp.swapaxes(gammas, -1, -2)).astype(jnp.bfloat16)
    thetas = thetas.astype(jnp.float32)
    outs = []
    for k in range(K):
        Jk = J[k]
        s = jnp.tanh(thetas)
        for inv_t in _INV_TEMPS:
            field = jnp.dot(s.astype(jnp.bfloat16), Jk,
                            preferred_element_type=jnp.float32) + thetas
            s = jnp.tanh(field * inv_t)
        js = jnp.dot(s.astype(jnp.bfloat16), Jk, preferred_element_type=jnp.float32)
        energy = -0.5 * jnp.sum(s * js, axis=-1) - jnp.sum(thetas * s, axis=-1)
        outs.append(lambdas[k] * energy + offsets[k])
    stacked = jnp.stack(outs, axis=1)                                  # (B, K)
    return stacked @ comb_w + comb_b[0]                                # (B,)


if __name__ == "__main__":
    # Small shapes consistent with the module's forward.
    B = 8                     # batch
    N = 32                    # sizeAnnealModel
    K = 4                     # num_ising_perceptrons  (K*N = 128: lane-full)

    key = jax.random.PRNGKey(0)
    k_th, k_g, k_gu, k_l, k_o, k_w, k_b = jax.random.split(key, 7)

    thetas = jax.random.normal(k_th, (B, N), dtype=jnp.float32)

    # gamma_i = triu(randn(N,N)*0.01 + U(-0.1,0.1), diagonal=1)
    g_base = jax.random.normal(k_g, (K, N, N), dtype=jnp.float32) * 0.01
    g_shift = jax.random.uniform(k_gu, (K, 1, 1), minval=-0.1, maxval=0.1)
    tri_mask = jnp.triu(jnp.ones((N, N), dtype=jnp.float32), k=1)
    gammas = (g_base + g_shift) * tri_mask

    # lambda_i = 1.0 + U(-0.1, 0.1); offset_i = 0.0 + U(-0.1, 0.1)
    lambdas = (1.0 + jax.random.uniform(k_l, (K,), minval=-0.1, maxval=0.1)).astype(jnp.float32)
    offsets = (0.0 + jax.random.uniform(k_o, (K,), minval=-0.1, maxval=0.1)).astype(jnp.float32)

    # Combiner Linear(K, 1, bias=True): default torch init ~ U(-1/sqrt(K), 1/sqrt(K))
    bound = 1.0 / np.sqrt(K)
    comb_w = jax.random.uniform(k_w, (K,), minval=-bound, maxval=bound).astype(jnp.float32)
    comb_b = jax.random.uniform(k_b, (1,), minval=-bound, maxval=bound).astype(jnp.float32)

    out = multi_ising_forward(thetas, gammas, lambdas, offsets, comb_w, comb_b)
    out = jax.block_until_ready(out)

    ref = multi_ising_reference(thetas, gammas, lambdas, offsets, comb_w, comb_b)
    np.testing.assert_allclose(np.asarray(out), np.asarray(ref), rtol=1e-3, atol=1e-3)

    assert out.shape == (B,)
    print("KERNEL_OK")
</pallas_src>

<mosaic_0001>
module attributes {stable_mosaic.version = 11 : i64} {
  func.func @_multi_ising_kernel(%arg0: memref<8x128xf32, #tpu.memory_space<vmem>>, %arg1: memref<128x128xbf16, #tpu.memory_space<vmem>>, %arg2: memref<128x4xf32, #tpu.memory_space<vmem>>, %arg3: memref<8x4xf32, #tpu.memory_space<vmem>>) attributes {dimension_semantics = [], scalar_prefetch = 0 : i64, scratch_operands = 0 : i64, tpu.core_type = #tpu.core_type<tc>} {
    %c0 = arith.constant 0 : index
    %c0_0 = arith.constant 0 : index
    %0 = vector.load %arg0[%c0, %c0_0] : memref<8x128xf32, #tpu.memory_space<vmem>>, vector<8x128xf32>
    %c0_1 = arith.constant 0 : index
    %c0_2 = arith.constant 0 : index
    %1 = vector.load %arg1[%c0_1, %c0_2] : memref<128x128xbf16, #tpu.memory_space<vmem>>, vector<128x128xbf16>
    %c0_3 = arith.constant 0 : index
    %c0_4 = arith.constant 0 : index
    %2 = vector.load %arg2[%c0_3, %c0_4] : memref<128x4xf32, #tpu.memory_space<vmem>>, vector<128x4xf32>
    %3 = math.tanh %0 : vector<8x128xf32>
    %4 = arith.truncf %3 : vector<8x128xf32> to vector<8x128xbf16>
    %cst = arith.constant dense<0.000000e+00> : vector<8x128xf32>
    %5 = tpu.matmul %4, %1, %cst {dimension_numbers = #tpu.dot_dimension_numbers<[1], [0], [0], [1], [0, 0, 1, 1], [], []>} : vector<8x128xbf16>, vector<128x128xbf16>, vector<8x128xf32> -> vector<8x128xf32>
    %6 = arith.addf %5, %0 : vector<8x128xf32>
    %cst_5 = arith.constant 5.000000e-01 : f32
    %7 = vector.broadcast %cst_5 : f32 to vector<8x128xf32>
    %8 = arith.mulf %6, %7 : vector<8x128xf32>
    %9 = math.tanh %8 : vector<8x128xf32>
    %10 = arith.truncf %9 : vector<8x128xf32> to vector<8x128xbf16>
    %cst_6 = arith.constant dense<0.000000e+00> : vector<8x128xf32>
    %11 = tpu.matmul %10, %1, %cst_6 {dimension_numbers = #tpu.dot_dimension_numbers<[1], [0], [0], [1], [0, 0, 1, 1], [], []>} : vector<8x128xbf16>, vector<128x128xbf16>, vector<8x128xf32> -> vector<8x128xf32>
    %12 = arith.addf %11, %0 : vector<8x128xf32>
    %cst_7 = arith.constant 0.559006214 : f32
    %13 = vector.broadcast %cst_7 : f32 to vector<8x128xf32>
    %14 = arith.mulf %12, %13 : vector<8x128xf32>
    %15 = math.tanh %14 : vector<8x128xf32>
    %16 = arith.truncf %15 : vector<8x128xf32> to vector<8x128xbf16>
    %cst_8 = arith.constant dense<0.000000e+00> : vector<8x128xf32>
    %17 = tpu.matmul %16, %1, %cst_8 {dimension_numbers = #tpu.dot_dimension_numbers<[1], [0], [0], [1], [0, 0, 1, 1], [], []>} : vector<8x128xbf16>, vector<128x128xbf16>, vector<8x128xf32> -> vector<8x128xf32>
    %18 = arith.addf %17, %0 : vector<8x128xf32>
    %cst_9 = arith.constant 0.633802831 : f32
    %19 = vector.broadcast %cst_9 : f32 to vector<8x128xf32>
    %20 = arith.mulf %18, %19 : vector<8x128xf32>
    %21 = math.tanh %20 : vector<8x128xf32>
    %22 = arith.truncf %21 : vector<8x128xf32> to vector<8x128xbf16>
    %cst_10 = arith.constant dense<0.000000e+00> : vector<8x128xf32>
    %23 = tpu.matmul %22, %1, %cst_10 {dimension_numbers = #tpu.dot_dimension_numbers<[1], [0], [0], [1], [0, 0, 1, 1], [], []>} : vector<8x128xbf16>, vector<128x128xbf16>, vector<8x128xf32> -> vector<8x128xf32>
    %24 = arith.addf %23, %0 : vector<8x128xf32>
    %cst_11 = arith.constant 0.731707335 : f32
    %25 = vector.broadcast %cst_11 : f32 to vector<8x128xf32>
    %26 = arith.mulf %24, %25 : vector<8x128xf32>
    %27 = math.tanh %26 : vector<8x128xf32>
    %28 = arith.truncf %27 : vector<8x128xf32> to vector<8x128xbf16>
    %cst_12 = arith.constant dense<0.000000e+00> : vector<8x128xf32>
    %29 = tpu.matmul %28, %1, %cst_12 {dimension_numbers = #tpu.dot_dimension_numbers<[1], [0], [0], [1], [0, 0, 1, 1], [], []>} : vector<8x128xbf16>, vector<128x128xbf16>, vector<8x128xf32> -> vector<8x128xf32>
    %30 = arith.addf %29, %0 : vector<8x128xf32>
    %cst_13 = arith.constant 0.865384638 : f32
    %31 = vector.broadcast %cst_13 : f32 to vector<8x128xf32>
    %32 = arith.mulf %30, %31 : vector<8x128xf32>
    %33 = math.tanh %32 : vector<8x128xf32>
    %34 = arith.truncf %33 : vector<8x128xf32> to vector<8x128xbf16>
    %cst_14 = arith.constant dense<0.000000e+00> : vector<8x128xf32>
    %35 = tpu.matmul %34, %1, %cst_14 {dimension_numbers = #tpu.dot_dimension_numbers<[1], [0], [0], [1], [0, 0, 1, 1], [], []>} : vector<8x128xbf16>, vector<128x128xbf16>, vector<8x128xf32> -> vector<8x128xf32>
    %36 = arith.addf %35, %0 : vector<8x128xf32>
    %cst_15 = arith.constant 1.05882359 : f32
    %37 = vector.broadcast %cst_15 : f32 to vector<8x128xf32>
    %38 = arith.mulf %36, %37 : vector<8x128xf32>
    %39 = math.tanh %38 : vector<8x128xf32>
    %40 = arith.truncf %39 : vector<8x128xf32> to vector<8x128xbf16>
    %cst_16 = arith.constant dense<0.000000e+00> : vector<8x128xf32>
    %41 = tpu.matmul %40, %1, %cst_16 {dimension_numbers = #tpu.dot_dimension_numbers<[1], [0], [0], [1], [0, 0, 1, 1], [], []>} : vector<8x128xbf16>, vector<128x128xbf16>, vector<8x128xf32> -> vector<8x128xf32>
    %42 = arith.addf %41, %0 : vector<8x128xf32>
    %cst_17 = arith.constant 1.36363637 : f32
    %43 = vector.broadcast %cst_17 : f32 to vector<8x128xf32>
    %44 = arith.mulf %42, %43 : vector<8x128xf32>
    %45 = math.tanh %44 : vector<8x128xf32>
    %46 = arith.truncf %45 : vector<8x128xf32> to vector<8x128xbf16>
    %cst_18 = arith.constant dense<0.000000e+00> : vector<8x128xf32>
    %47 = tpu.matmul %46, %1, %cst_18 {dimension_numbers = #tpu.dot_dimension_numbers<[1], [0], [0], [1], [0, 0, 1, 1], [], []>} : vector<8x128xbf16>, vector<128x128xbf16>, vector<8x128xf32> -> vector<8x128xf32>
    %48 = arith.addf %47, %0 : vector<8x128xf32>
    %cst_19 = arith.constant 1.91489363 : f32
    %49 = vector.broadcast %cst_19 : f32 to vector<8x128xf32>
    %50 = arith.mulf %48, %49 : vector<8x128xf32>
    %51 = math.tanh %50 : vector<8x128xf32>
    %52 = arith.truncf %51 : vector<8x128xf32> to vector<8x128xbf16>
    %cst_20 = arith.constant dense<0.000000e+00> : vector<8x128xf32>
    %53 = tpu.matmul %52, %1, %cst_20 {dimension_numbers = #tpu.dot_dimension_numbers<[1], [0], [0], [1], [0, 0, 1, 1], [], []>} : vector<8x128xbf16>, vector<128x128xbf16>, vector<8x128xf32> -> vector<8x128xf32>
    %54 = arith.addf %53, %0 : vector<8x128xf32>
    %cst_21 = arith.constant 3.21428561 : f32
    %55 = vector.broadcast %cst_21 : f32 to vector<8x128xf32>
    %56 = arith.mulf %54, %55 : vector<8x128xf32>
    %57 = math.tanh %56 : vector<8x128xf32>
    %58 = arith.truncf %57 : vector<8x128xf32> to vector<8x128xbf16>
    %cst_22 = arith.constant dense<0.000000e+00> : vector<8x128xf32>
    %59 = tpu.matmul %58, %1, %cst_22 {dimension_numbers = #tpu.dot_dimension_numbers<[1], [0], [0], [1], [0, 0, 1, 1], [], []>} : vector<8x128xbf16>, vector<128x128xbf16>, vector<8x128xf32> -> vector<8x128xf32>
    %60 = arith.addf %59, %0 : vector<8x128xf32>
    %cst_23 = arith.constant 1.000000e+01 : f32
    %61 = vector.broadcast %cst_23 : f32 to vector<8x128xf32>
    %62 = arith.mulf %60, %61 : vector<8x128xf32>
    %63 = math.tanh %62 : vector<8x128xf32>
    %64 = arith.truncf %63 : vector<8x128xf32> to vector<8x128xbf16>
    %cst_24 = arith.constant dense<0.000000e+00> : vector<8x128xf32>
    %65 = tpu.matmul %64, %1, %cst_24 {dimension_numbers = #tpu.dot_dimension_numbers<[1], [0], [0], [1], [0, 0, 1, 1], [], []>} : vector<8x128xbf16>, vector<128x128xbf16>, vector<8x128xf32> -> vector<8x128xf32>
    %cst_25 = arith.constant -5.000000e-01 : f32
    %66 = vector.broadcast %cst_25 : f32 to vector<8x128xf32>
    %67 = arith.mulf %66, %63 : vector<8x128xf32>
    %68 = arith.mulf %67, %65 : vector<8x128xf32>
    %69 = arith.mulf %0, %63 : vector<8x128xf32>
    %70 = arith.subf %68, %69 : vector<8x128xf32>
    %cst_26 = arith.constant dense<0.000000e+00> : vector<8x4xf32>
    %71 = tpu.matmul %70, %2, %cst_26 {dimension_numbers = #tpu.dot_dimension_numbers<[1], [0], [0], [1], [0, 0, 1, 1], [], []>} : vector<8x128xf32>, vector<128x4xf32>, vector<8x4xf32> -> vector<8x4xf32>
    %c0_27 = arith.constant 0 : index
    %c0_28 = arith.constant 0 : index
    %72 = vector.load %arg3[%c0_27, %c0_28] : memref<8x4xf32, #tpu.memory_space<vmem>>, vector<8x4xf32>
    tpu.vector_store %arg3[%c0_27, %c0_28], %71 {strides = array<i32>} : memref<8x4xf32, #tpu.memory_space<vmem>>, vector<8x4xf32>,
    return
  }
}

</mosaic_0001>

<bundles_post_ra>
// kernel: tpu_custom_call.1
= control target key start
LH: loop header
LB: loop body
LE: loop exit
PB: predicated region body
PF: predicated region fallthrough
CT: control target
= control target key end

     0   :  { %vm294_vm0 = vcmask 31744   ;;  %s578_s1 = inlined_call_operand.vmem [shape: bf16[128,128], index: 1, kind: input, shape index: {}]   ;;  %s579_s0 = inlined_call_operand.vmem [shape: f32[8,128], index: 0, kind: input, shape index: {}]   ;;  %s580_s2 = inlined_call_operand.vmem [shape: f32[128,4], index: 2, kind: input, shape index: {}]   ;;  %s581_s3 = inlined_call_operand.vmem [shape: f32[8,4], index: 3, kind: output, shape index: {}]  }
   0x1   :  { %v385_v0 = vld [vmem:[%s578_s1 + $0x38] sm:$0xff]  ;;  %v391_v1 = vld [vmem:[%s578_s1 + $0x30] sm:$0xff]  ;;  %v400_v2 = vld [vmem:[%s578_s1 + $0x28] sm:$0xff] }
   0x2   :  { %97 = vmatpush.bf16.msra.mxu0 %v385_v0  ;;  %113 = vmatpush.bf16.msra.mxu1 %v385_v0  ;;  %v409_v3 = vld [vmem:[%s578_s1 + $0x20] sm:$0xff]  ;;  %v418_v4 = vld [vmem:[%s578_s1 + $0x18] sm:$0xff]  ;;  %v432_v6 = vld [vmem:[%s578_s1 + $0x10] sm:$0xff] }
   0x3   :  { %129 = vmatpush.bf16.msra.mxu2 %v385_v0  ;;  %145 = vmatpush.bf16.msra.mxu3 %v385_v0  ;;  %v426_v5 = vld [vmem:[%s579_s0] sm:$0xff]  ;;  %v442_v7 = vld [vmem:[%s578_s1 + $0x8] sm:$0xff] }
   0x4   :  { %340 = vtanh.f32 %v426_v5  ;;  %v451_v9 = vld [vmem:[%s578_s1] sm:$0xff] }
   0x6   :  { %98 = vmatpush.bf16.msra.mxu0 %v391_v1  ;;  %114 = vmatpush.bf16.msra.mxu1 %v391_v1 }
   0x7   :  { %130 = vmatpush.bf16.msra.mxu2 %v391_v1  ;;  %146 = vmatpush.bf16.msra.mxu3 %v391_v1 }
   0xa   :  { %99 = vmatpush.bf16.msra.mxu0 %v400_v2  ;;  %115 = vmatpush.bf16.msra.mxu1 %v400_v2  ;;  %v341_v8 = vpop.eup %340 }
   0xb   :  { %131 = vmatpush.bf16.msra.mxu2 %v400_v2  ;;  %147 = vmatpush.bf16.msra.mxu3 %v400_v2  ;;  %v48_v10 = vpack.c.bf16 %v341_v8, %v341_v8  ;;  %v40_v8 = vld [vmem:[%s580_s2 + $0x48] sm:$0xff] }
   0xe   :  { %100 = vmatpush.bf16.msra.mxu0 %v409_v3  ;;  %116 = vmatpush.bf16.msra.mxu1 %v409_v3 }
   0xf   :  { %132 = vmatpush.bf16.msra.mxu2 %v409_v3  ;;  %148 = vmatpush.bf16.msra.mxu3 %v409_v3 }
  0x12   :  { %101 = vmatpush.bf16.msra.mxu0 %v418_v4  ;;  %117 = vmatpush.bf16.msra.mxu1 %v418_v4 }
  0x13   :  { %133 = vmatpush.bf16.msra.mxu2 %v418_v4  ;;  %149 = vmatpush.bf16.msra.mxu3 %v418_v4 }
  0x16   :  { %102 = vmatpush.bf16.msra.mxu0 %v432_v6  ;;  %118 = vmatpush.bf16.msra.mxu1 %v432_v6 }
  0x17   :  { %134 = vmatpush.bf16.msra.mxu2 %v432_v6  ;;  %150 = vmatpush.bf16.msra.mxu3 %v432_v6 }
  0x1a   :  { %103 = vmatpush.bf16.msra.mxu0 %v442_v7  ;;  %119 = vmatpush.bf16.msra.mxu1 %v442_v7 }
  0x1b   :  { %135 = vmatpush.bf16.msra.mxu2 %v442_v7  ;;  %151 = vmatpush.bf16.msra.mxu3 %v442_v7 }
  0x1e   :  { %104 = vmatpush.bf16.msra.mxu0 %v451_v9  ;;  %120 = vmatpush.bf16.msra.mxu1 %v451_v9 }
  0x1f   :  { %136 = vmatpush.bf16.msra.mxu2 %v451_v9  ;;  %152 = vmatpush.bf16.msra.mxu3 %v451_v9 }
  0x21   :  { %105 = vmatmul.bf16.vlgmr.msra.gmra.mxu0 %v48_v10  ;;  %v38_v10 = vld [vmem:[%s580_s2 + $0x38] sm:$0xff] }
  0x22   :  { %161 = vmatpush.bf16.msrb.mxu0 %v385_v0  ;;  %177 = vmatpush.bf16.msrb.mxu1 %v385_v0 }
  0x23   :  { %193 = vmatpush.bf16.msrb.mxu2 %v385_v0  ;;  %209 = vmatpush.bf16.msrb.mxu3 %v385_v0 }
  0x26   :  { %162 = vmatpush.bf16.msrb.mxu0 %v391_v1  ;;  %178 = vmatpush.bf16.msrb.mxu1 %v391_v1 }
  0x27   :  { %194 = vmatpush.bf16.msrb.mxu2 %v391_v1  ;;  %210 = vmatpush.bf16.msrb.mxu3 %v391_v1 }
  0x2a   :  { %163 = vmatpush.bf16.msrb.mxu0 %v400_v2  ;;  %179 = vmatpush.bf16.msrb.mxu1 %v400_v2 }
  0x2b   :  { %195 = vmatpush.bf16.msrb.mxu2 %v400_v2  ;;  %211 = vmatpush.bf16.msrb.mxu3 %v400_v2 }
  0x2e   :  { %164 = vmatpush.bf16.msrb.mxu0 %v409_v3  ;;  %180 = vmatpush.bf16.msrb.mxu1 %v409_v3 }
  0x2f   :  { %196 = vmatpush.bf16.msrb.mxu2 %v409_v3  ;;  %212 = vmatpush.bf16.msrb.mxu3 %v409_v3 }
  0x32   :  { %165 = vmatpush.bf16.msrb.mxu0 %v418_v4  ;;  %181 = vmatpush.bf16.msrb.mxu1 %v418_v4 }
  0x33   :  { %197 = vmatpush.bf16.msrb.mxu2 %v418_v4  ;;  %213 = vmatpush.bf16.msrb.mxu3 %v418_v4 }
  0x36   :  { %166 = vmatpush.bf16.msrb.mxu0 %v432_v6  ;;  %182 = vmatpush.bf16.msrb.mxu1 %v432_v6 }
  0x37   :  { %198 = vmatpush.bf16.msrb.mxu2 %v432_v6  ;;  %214 = vmatpush.bf16.msrb.mxu3 %v432_v6 }
  0x3a   :  { %167 = vmatpush.bf16.msrb.mxu0 %v442_v7  ;;  %183 = vmatpush.bf16.msrb.mxu1 %v442_v7 }
  0x3b   :  { %199 = vmatpush.bf16.msrb.mxu2 %v442_v7  ;;  %215 = vmatpush.bf16.msrb.mxu3 %v442_v7 }
  0x3e   :  { %168 = vmatpush.bf16.msrb.mxu0 %v451_v9  ;;  %184 = vmatpush.bf16.msrb.mxu1 %v451_v9 }
  0x3f   :  { %200 = vmatpush.bf16.msrb.mxu2 %v451_v9  ;;  %216 = vmatpush.bf16.msrb.mxu3 %v451_v9 }
  0x42   :  { %225 = vmatpush.bf16.msra.mxu0 %v385_v0 }
  0x46   :  { %226 = vmatpush.bf16.msra.mxu0 %v391_v1 }
  0x4a   :  { %227 = vmatpush.bf16.msra.mxu0 %v400_v2 }
  0x4e   :  { %228 = vmatpush.bf16.msra.mxu0 %v409_v3 }
  0x52   :  { %229 = vmatpush.bf16.msra.mxu0 %v418_v4 }
  0x56   :  { %230 = vmatpush.bf16.msra.mxu0 %v432_v6 }
  0x5a   :  { %231 = vmatpush.bf16.msra.mxu0 %v442_v7 }
  0x5e   :  { %232 = vmatpush.bf16.msra.mxu0 %v451_v9 }
  0x9e   :  { %v106_v11 = vpop.f32.mrf.mxu0 }
  0x9f   :  { %v107_v12 = vadd.f32 %v106_v11, %v426_v5  ;;  %v37_v11 = vld [vmem:[%s580_s2 + $0x30] sm:$0xff] }
  0xa1   :  { %v110_v13 = vmul.f32 0.5, %v107_v12 }
  0xa3   :  { %342 = vtanh.f32 %v110_v13  ;;  %v36_v13 = vld [vmem:[%s580_s2 + $0x28] sm:$0xff] }
  0xa6   :  { %v108_v14 = vpop.f32.mrf.mxu0 }
  0xa9   :  { %v343_v15 = vpop.eup %342 }
  0xaa   :  { %v112_v16 = vpack.c.bf16 %v343_v15, %v343_v15  ;;  %v35_v15 = vld [vmem:[%s580_s2 + $0x20] sm:$0xff] }
  0xac   :  { %121 = vmatmul.bf16.vlgmr.msra.gmra.mxu1 %v112_v16 }
  0xad   :  { %241 = vmatpush.bf16.msra.mxu1 %v385_v0 }
  0xb1   :  { %242 = vmatpush.bf16.msra.mxu1 %v391_v1 }
  0xb5   :  { %243 = vmatpush.bf16.msra.mxu1 %v400_v2 }
  0xb9   :  { %244 = vmatpush.bf16.msra.mxu1 %v409_v3 }
  0xbd   :  { %245 = vmatpush.bf16.msra.mxu1 %v418_v4 }
  0xc1   :  { %246 = vmatpush.bf16.msra.mxu1 %v432_v6 }
  0xc5   :  { %247 = vmatpush.bf16.msra.mxu1 %v442_v7 }
  0xc9   :  { %248 = vmatpush.bf16.msra.mxu1 %v451_v9 }
 0x129   :  { %v122_v17 = vpop.f32.mrf.mxu1 }
 0x12a   :  { %v123_v18 = vadd.f32 %v122_v17, %v426_v5  ;;  %v34_v17 = vld [vmem:[%s580_s2 + $0x18] sm:$0xff] }
 0x12c   :  { %v126_v19 = vmul.f32 0.5590062, %v123_v18 }
 0x12e   :  { %344 = vtanh.f32 %v126_v19 }
 0x131   :  { %v124_v20 = vpop.f32.mrf.mxu1 }
 0x134   :  { %v345_v21 = vpop.eup %344 }
 0x135   :  { %v128_v22 = vpack.c.bf16 %v345_v21, %v345_v21  ;;  %v33_v21 = vld [vmem:[%s580_s2 + $0x10] sm:$0xff] }
 0x137   :  { %137 = vmatmul.bf16.vlgmr.msra.gmra.mxu2 %v128_v22  ;;  %v32_v22 = vld [vmem:[%s580_s2 + $0x8] sm:$0xff] }
 0x138   :  { %257 = vmatpush.bf16.msra.mxu2 %v385_v0 }
 0x13c   :  { %258 = vmatpush.bf16.msra.mxu2 %v391_v1  ;;  %v46_v1 = vld [vmem:[%s580_s2 + $0x78] sm:$0xff] }
 0x140   :  { %259 = vmatpush.bf16.msra.mxu2 %v400_v2  ;;  %v45_v2 = vld [vmem:[%s580_s2 + $0x70] sm:$0xff] }
 0x144   :  { %260 = vmatpush.bf16.msra.mxu2 %v409_v3  ;;  %v44_v3 = vld [vmem:[%s580_s2 + $0x68] sm:$0xff] }
 0x148   :  { %261 = vmatpush.bf16.msra.mxu2 %v418_v4  ;;  %v43_v4 = vld [vmem:[%s580_s2 + $0x60] sm:$0xff] }
 0x14c   :  { %262 = vmatpush.bf16.msra.mxu2 %v432_v6  ;;  %v42_v6 = vld [vmem:[%s580_s2 + $0x58] sm:$0xff] }
 0x150   :  { %263 = vmatpush.bf16.msra.mxu2 %v442_v7  ;;  %v41_v7 = vld [vmem:[%s580_s2 + $0x50] sm:$0xff] }
 0x154   :  { %264 = vmatpush.bf16.msra.mxu2 %v451_v9  ;;  %v39_v9 = vld [vmem:[%s580_s2 + $0x40] sm:$0xff] }
 0x1ba   :  { %v138_v23 = vpop.f32.mrf.mxu2 }
 0x1bb   :  { %v139_v24 = vadd.f32 %v138_v23, %v426_v5  ;;  %v31_v23 = vld [vmem:[%s580_s2] sm:$0xff] }
 0x1bd   :  { %v142_v25 = vmul.f32 0.63380283, %v139_v24 }
 0x1bf   :  { %346 = vtanh.f32 %v142_v25 }
 0x1c2   :  { %v140_v26 = vpop.f32.mrf.mxu2 }
 0x1c5   :  { %v347_v27 = vpop.eup %346 }
 0x1c6   :  { %v144_v28 = vpack.c.bf16 %v347_v27, %v347_v27 }
 0x1c8   :  { %153 = vmatmul.bf16.vlgmr.msra.gmra.mxu3 %v144_v28 }
 0x1c9   :  { %274 = vmatpush.msra.mxu3 %v46_v1 }
 0x1cb   :  { %275 = vmatpush.msra.mxu3 %v45_v2 }
 0x1cd   :  { %276 = vmatpush.msra.mxu3 %v44_v3 }
 0x1cf   :  { %277 = vmatpush.msra.mxu3 %v43_v4 }
 0x1d1   :  { %278 = vmatpush.msra.mxu3 %v42_v6 }
 0x1d3   :  { %279 = vmatpush.msra.mxu3 %v41_v7 }
 0x1d5   :  { %280 = vmatpush.msra.mxu3 %v40_v8 }
 0x1d7   :  { %281 = vmatpush.msra.mxu3 %v39_v9 }
 0x1d9   :  { %282 = vmatpush.msra.mxu3 %v38_v10 }
 0x1db   :  { %283 = vmatpush.msra.mxu3 %v37_v11 }
 0x1dd   :  { %284 = vmatpush.msra.mxu3 %v36_v13 }
 0x1df   :  { %285 = vmatpush.msra.mxu3 %v35_v15 }
 0x1e1   :  { %286 = vmatpush.msra.mxu3 %v34_v17 }
 0x1e3   :  { %287 = vmatpush.msra.mxu3 %v33_v21 }
 0x1e5   :  { %288 = vmatpush.msra.mxu3 %v32_v22 }
 0x1e7   :  { %289 = vmatpush.msra.mxu3 %v31_v23 }
 0x24b   :  { %v154_v29 = vpop.f32.mrf.mxu3 }
 0x24c   :  { %v155_v30 = vadd.f32 %v154_v29, %v426_v5 }
 0x24e   :  { %v158_v31 = vmul.f32 0.73170733, %v155_v30 }
 0x250   :  { %348 = vtanh.f32 %v158_v31 }
 0x253   :  { %v156_v32 = vpop.f32.mrf.mxu3 }
 0x256   :  { %v349_v33 = vpop.eup %348 }
 0x257   :  { %v160_v34 = vpack.c.bf16 %v349_v33, %v349_v33 }
 0x259   :  { %169 = vmatmul.bf16.vlgmr.msrb.gmra.mxu0 %v160_v34 }
 0x2d6   :  { %v170_v35 = vpop.f32.mrf.mxu0 }
 0x2d7   :  { %v171_v36 = vadd.f32 %v170_v35, %v426_v5 }
 0x2d9   :  { %v174_v37 = vmul.f32 0.86538464, %v171_v36 }
 0x2db   :  { %350 = vtanh.f32 %v174_v37 }
 0x2de   :  { %v172_v38 = vpop.f32.mrf.mxu0 }
 0x2e1   :  { %v351_v39 = vpop.eup %350 }
 0x2e2   :  { %v176_v40 = vpack.c.bf16 %v351_v39, %v351_v39 }
 0x2e4   :  { %185 = vmatmul.bf16.vlgmr.msrb.gmra.mxu1 %v176_v40 }
 0x361   :  { %v186_v41 = vpop.f32.mrf.mxu1 }
 0x362   :  { %v187_v42 = vadd.f32 %v186_v41, %v426_v5 }
 0x364   :  { %v190_v43 = vmul.f32 1.0588236, %v187_v42 }
 0x366   :  { %352 = vtanh.f32 %v190_v43 }
 0x369   :  { %v188_v44 = vpop.f32.mrf.mxu1 }
 0x36c   :  { %v353_v45 = vpop.eup %352 }
 0x36d   :  { %v192_v46 = vpack.c.bf16 %v353_v45, %v353_v45 }
 0x36f   :  { %201 = vmatmul.bf16.vlgmr.msrb.gmra.mxu2 %v192_v46 }
 0x3f2   :  { %v202_v47 = vpop.f32.mrf.mxu2 }
 0x3f3   :  { %v203_v48 = vadd.f32 %v202_v47, %v426_v5 }
 0x3f5   :  { %v206_v49 = vmul.f32 1.3636364, %v203_v48 }
 0x3f7   :  { %354 = vtanh.f32 %v206_v49 }
 0x3fa   :  { %v204_v50 = vpop.f32.mrf.mxu2 }
 0x3fd   :  { %v355_v51 = vpop.eup %354 }
 0x3fe   :  { %v208_v52 = vpack.c.bf16 %v355_v51, %v355_v51 }
 0x400   :  { %217 = vmatmul.bf16.vlgmr.msrb.gmra.mxu3 %v208_v52 }
 0x483   :  { %v218_v53 = vpop.f32.mrf.mxu3 }
 0x484   :  { %v219_v54 = vadd.f32 %v218_v53, %v426_v5 }
 0x486   :  { %v222_v55 = vmul.f32 1.9148936, %v219_v54 }
 0x488   :  { %356 = vtanh.f32 %v222_v55 }
 0x48b   :  { %v220_v56 = vpop.f32.mrf.mxu3 }
 0x48e   :  { %v357_v57 = vpop.eup %356 }
 0x48f   :  { %v224_v58 = vpack.c.bf16 %v357_v57, %v357_v57 }
 0x491   :  { %233 = vmatmul.bf16.vlgmr.msra.gmra.mxu0 %v224_v58 }
 0x50e   :  { %v234_v59 = vpop.f32.mrf.mxu0 }
 0x50f   :  { %v235_v60 = vadd.f32 %v234_v59, %v426_v5 }
 0x511   :  { %v238_v61 = vmul.f32 3.2142856, %v235_v60 }
 0x513   :  { %358 = vtanh.f32 %v238_v61 }
 0x516   :  { %v236_v62 = vpop.f32.mrf.mxu0 }
 0x519   :  { %v359_v63 = vpop.eup %358 }
 0x51a   :  { %v240_v0 = vpack.c.bf16 %v359_v63, %v359_v63 }
 0x51c   :  { %249 = vmatmul.bf16.vlgmr.msra.gmra.mxu1 %v240_v0 }
 0x599   :  { %v250_v12 = vpop.f32.mrf.mxu1 }
 0x59a   :  { %v251_v14 = vadd.f32 %v250_v12, %v426_v5 }
 0x59c   :  { %v254_v16 = vmul.f32 10.0, %v251_v14 }
 0x59e   :  { %360 = vtanh.f32 %v254_v16 }
 0x5a1   :  { %v252_v18 = vpop.f32.mrf.mxu1 }
 0x5a4   :  { %v361_v19 = vpop.eup %360 }
 0x5a5   :  { %v256_v20 = vpack.c.bf16 %v361_v19, %v361_v19  ;;  %v270_v24 = vmul.f32 -0.5, %v361_v19  ;;  %v272_v27 = vmul.f32 %v361_v19, %v426_v5 }
 0x5a7   :  { %265 = vmatmul.bf16.vlgmr.msra.gmra.mxu2 %v256_v20 }
 0x62a   :  { %v266_v25 = vpop.f32.mrf.mxu2 }
 0x62b   :  { %v271_v26 = vmul.f32 %v270_v24, %v266_v25 }
 0x62d   :  { %v273_v28 = vsub.f32 %v271_v26, %v272_v27 }
 0x62f   :  { %290 = vmatmul.f32.vlgmr.msra.gmra.mxu3 %v273_v28 }
 0x632   :  { %v268_v29 = vpop.f32.mrf.mxu2 }
 0x6b2   :  { %v291_v30 = vpop.f32.mrf.mxu3 }
 0x6b3   :  { %295 = vst.msk [vmem:[%s581_s3] sm:$0xff] %vm294_vm0, %v291_v30 }

</bundles_post_ra>
